<compile_context>
chip_gen: v5e
topology: v5e:2x2
jax: 0.10.0
libtpu: 0.0.40
codegen_flags: <defaults>
</compile_context>

<pallas_src>
import functools

import jax
import jax.numpy as jnp
from jax import lax
from jax.experimental import pallas as pl
from jax.experimental.pallas import tpu as pltpu

LANE = 128
_TINY_ELEMS = 256 * 1024            # below this a standalone pallas_call is pure overhead
_TILE_BYTES = 4 * 1024 * 1024       # HBM->VMEM bytes per input per buffer (per grid step)
_CHUNK_F32_BYTES = 2 * 1024 * 1024  # cap on f32 temporaries per strip-mined chunk
_CHUNK_ROWS_CAP = 256               # rows per in-kernel chunk (multiple of 8/16/32)
_VMEM_LIMIT = 32 * 1024 * 1024      # scoped VMEM: safe on v5e / v6e / v7x


def _round_up(x: int, m: int) -> int:
    return (x + m - 1) // m * m


def _sym_dist_kernel(p1_ref, p2_ref, out_ref, *, tile_bs: int, chunk: int,
                     bs: int, mult: int, need_mask: bool):
    i = pl.program_id(1)
    steps = pl.num_programs(1)

    # Resident (1, 1, C) accumulator: zeroed at the start of the reduction axis.
    @pl.when(i == 0)
    def _():
        out_ref[...] = jnp.zeros_like(out_ref)

    # UNclamped block id (the index_map clamps to stay in-bounds); used only for
    # the validity mask, so a clamped duplicate block contributes exactly 0.
    block_id = pl.program_id(0) * steps + i
    row0 = block_id * tile_bs

    def accum(start):
        d = (p1_ref[pl.ds(start, chunk), :].astype(jnp.float32)
             - p2_ref[pl.ds(start, chunk), :].astype(jnp.float32))
        if need_mask:
            rid = row0 + start + lax.broadcasted_iota(jnp.int32, (chunk, 1), 0)
            d = jnp.where(rid < bs, d, 0.0)
        out_ref[0] += jnp.sum(d * d, axis=0, keepdims=True)

    n_chunks = tile_bs // chunk
    if n_chunks == 1:
        accum(0)
    else:
        def body(k, carry):
            accum(pl.multiple_of(k * chunk, mult))
            return carry
        lax.fori_loop(0, n_chunks, body, 0, unroll=(n_chunks <= 8))


def class_sym_dist_loss(pred1: jax.Array, pred2: jax.Array, *,
                        force_pallas: bool = False):
    """Pallas equivalent of ClassSymDistLoss.forward -> (loss, bs)."""
    assert pred1.shape == pred2.shape
    assert pred1.ndim == 2
    bs, num_classes = pred1.shape
    n = bs * num_classes

    def _fallback():
        d = pred1.astype(jnp.float32) - pred2.astype(jnp.float32)
        return jnp.sum(d * d) / jnp.float32(num_classes), bs

    itemsize = jnp.dtype(pred1.dtype).itemsize
    mult = max(8, 32 // max(itemsize, 1))            # sublane granularity (f32/bf16/int8)
    c_pad = _round_up(max(num_classes, 1), LANE)     # lane-padded class width in VMEM
    too_wide = c_pad * mult * 4 > _TILE_BYTES        # class axis too wide to tile this way

    if n == 0 or too_wide or (n < _TINY_ELEMS and not force_pallas):
        # Tiny / degenerate inputs: let XLA fuse the reduction with neighbors.
        return _fallback()

    # ---- tile sizing: ~4 MiB per input per buffer, v7x-safe VMEM budget.
    budget_rows = _TILE_BYTES // (c_pad * itemsize)        # rows / input / buffer
    chunk_budget = _CHUNK_F32_BYTES // (c_pad * 4)         # rows / f32 temporary
    chunk = min(_CHUNK_ROWS_CAP, budget_rows, chunk_budget)
    chunk = max(mult, chunk // mult * mult)
    if bs <= chunk:
        tile_bs = chunk = bs                               # one block == full batch
    else:
        tile_bs = chunk * max(1, min(budget_rows, bs) // chunk)

    nblocks = pl.cdiv(bs, tile_bs)
    num_partials = 2 if nblocks >= 2 else 1                # leading "parallel" axis (v7x dual-TC)
    steps = pl.cdiv(nblocks, num_partials)
    need_mask = num_partials * steps * tile_bs > bs        # ragged last block / clamped dup

    in_map = lambda c, i: (jnp.minimum(c * steps + i, nblocks - 1), 0)
    in_spec = pl.BlockSpec((tile_bs, num_classes), in_map)

    partials = pl.pallas_call(
        functools.partial(_sym_dist_kernel, tile_bs=tile_bs, chunk=chunk,
                          bs=bs, mult=mult, need_mask=need_mask),
        out_shape=jax.ShapeDtypeStruct((num_partials, 1, num_classes),
                                       jnp.float32),
        grid_spec=pltpu.PrefetchScalarGridSpec(
            num_scalar_prefetch=0,
            grid=(num_partials, steps),
            in_specs=[in_spec, in_spec],
            out_specs=pl.BlockSpec((1, 1, num_classes), lambda c, i: (c, 0, 0)),
        ),
        compiler_params=pltpu.CompilerParams(
            dimension_semantics=("parallel", "arbitrary"),
            vmem_limit_bytes=_VMEM_LIMIT,
        ),
        cost_estimate=pl.CostEstimate(
            flops=3 * n,
            transcendentals=0,
            bytes_accessed=2 * n * itemsize + num_partials * num_classes * 4,
        ),
    )(pred1, pred2)

    # Tiny epilogue reduction + normalization: leave to XLA (fusable).
    loss = jnp.sum(partials) / jnp.float32(num_classes)
    return loss, bs


def _reference(pred1, pred2):
    num_classes = pred1.shape[1]
    d = pred1.astype(jnp.float32) - pred2.astype(jnp.float32)
    return jnp.sum(d * d) / num_classes


if __name__ == "__main__":
    key = jax.random.PRNGKey(0)
    keys = jax.random.split(key, 8)

    # (1) Tiny shape from the module spec, forced through the Pallas kernel
    #     (single full-array block), plus the auto fallback path.
    a1 = jax.random.normal(keys[0], (2, 32), dtype=jnp.float32)
    a2 = jax.random.normal(keys[1], (2, 32), dtype=jnp.float32)
    loss_a, bs_a = class_sym_dist_loss(a1, a2, force_pallas=True)
    loss_a = jax.block_until_ready(loss_a)
    assert bs_a == 2
    assert jnp.allclose(loss_a, _reference(a1, a2), rtol=1e-5, atol=1e-5), (
        loss_a, _reference(a1, a2))
    loss_fb, _ = class_sym_dist_loss(a1, a2)
    loss_fb = jax.block_until_ready(loss_fb)
    assert jnp.allclose(loss_fb, _reference(a1, a2), rtol=1e-5, atol=1e-5)

    # (2) Non-128-aligned class axis, single block, forced through the kernel.
    b1 = jax.random.normal(keys[2], (200, 1000), dtype=jnp.float32)
    b2 = jax.random.normal(keys[3], (200, 1000), dtype=jnp.float32)
    loss_b, bs_b = class_sym_dist_loss(b1, b2, force_pallas=True)
    loss_b = jax.block_until_ready(loss_b)
    assert bs_b == 200
    assert jnp.allclose(loss_b, _reference(b1, b2), rtol=1e-4, atol=1e-4), (
        loss_b, _reference(b1, b2))

    # (3) Aligned shape through the automatic kernel path (strip-mined chunks).
    c1 = jax.random.normal(keys[4], (512, 1024), dtype=jnp.float32)
    c2 = jax.random.normal(keys[5], (512, 1024), dtype=jnp.float32)
    loss_c, bs_c = class_sym_dist_loss(c1, c2)
    loss_c = jax.block_until_ready(loss_c)
    assert bs_c == 512
    assert jnp.allclose(loss_c, _reference(c1, c2), rtol=1e-4, atol=1e-4), (
        loss_c, _reference(c1, c2))

    # (4) Multi-block + two partial streams + ragged/masked last block
    #     (odd block count exercises the clamped duplicate block as well).
    d1 = jax.random.normal(keys[6], (2600, 1000), dtype=jnp.float32)
    d2 = jax.random.normal(keys[7], (2600, 1000), dtype=jnp.float32)
    loss_d, bs_d = class_sym_dist_loss(d1, d2)
    loss_d = jax.block_until_ready(loss_d)
    assert bs_d == 2600
    assert jnp.allclose(loss_d, _reference(d1, d2), rtol=1e-4, atol=1e-4), (
        loss_d, _reference(d1, d2))

    print("KERNEL_OK")
</pallas_src>

<mosaic_0001>
module attributes {stable_mosaic.version = 11 : i64} {
  func.func @_sym_dist_kernel(%arg0: i32, %arg1: i32, %arg2: memref<2x32xf32, #tpu.memory_space<vmem>>, %arg3: memref<2x32xf32, #tpu.memory_space<vmem>>, %arg4: memref<1x1x32xf32, #tpu.memory_space<vmem>>) attributes {dimension_semantics = [#tpu.dimension_semantics<parallel>, #tpu.dimension_semantics<arbitrary>], iteration_bounds = array<i64: 1, 1>, scalar_prefetch = 0 : i64, scratch_operands = 0 : i64, tpu.core_type = #tpu.core_type<tc>, window_params = [{transform_indices = @transform_0, window_bounds = array<i64: 2, 32>}, {transform_indices = @transform_1, window_bounds = array<i64: 2, 32>}, {transform_indices = @transform_2, window_bounds = array<i64: 1, 1, 32>}]} {
    %c0_i32 = arith.constant 0 : i32
    %0 = arith.cmpi eq, %arg1, %c0_i32 : i32
    %1 = arith.extui %0 : i1 to i32
    %c0_i32_0 = arith.constant 0 : i32
    %2 = arith.cmpi ne, %1, %c0_i32_0 : i32
    scf.if %2 {
      %cst_10 = arith.constant 0.000000e+00 : f32
      %15 = vector.broadcast %cst_10 : f32 to vector<1x1x32xf32>
      %c0_11 = arith.constant 0 : index
      %c0_12 = arith.constant 0 : index
      %c0_13 = arith.constant 0 : index
      %16 = vector.load %arg4[%c0_11, %c0_12, %c0_13] : memref<1x1x32xf32, #tpu.memory_space<vmem>>, vector<1x1x32xf32>
      tpu.vector_store %arg4[%c0_11, %c0_12, %c0_13], %15 {strides = array<i32>} : memref<1x1x32xf32, #tpu.memory_space<vmem>>, vector<1x1x32xf32>,
    } else {
    }
    %c0 = arith.constant 0 : index
    %c0_1 = arith.constant 0 : index
    %3 = vector.load %arg2[%c0, %c0_1] : memref<2x32xf32, #tpu.memory_space<vmem>>, vector<2x32xf32>
    %c0_2 = arith.constant 0 : index
    %c0_3 = arith.constant 0 : index
    %4 = vector.load %arg3[%c0_2, %c0_3] : memref<2x32xf32, #tpu.memory_space<vmem>>, vector<2x32xf32>
    %5 = arith.subf %3, %4 : vector<2x32xf32>
    %c0_4 = arith.constant 0 : index
    %c0_5 = arith.constant 0 : index
    %c0_6 = arith.constant 0 : index
    %6 = vector.load %arg4[%c0_4, %c0_5, %c0_6] : memref<1x1x32xf32, #tpu.memory_space<vmem>>, vector<1x1x32xf32>
    %7 = vector.shape_cast %6 : vector<1x1x32xf32> to vector<1x32xf32>
    %8 = arith.mulf %5, %5 : vector<2x32xf32>
    %cst = arith.constant dense<0.000000e+00> : vector<32xf32>
    %9 = vector.multi_reduction <add>, %8, %cst [0] : vector<2x32xf32> to vector<32xf32>
    %10 = vector.shape_cast %9 : vector<32xf32> to vector<1x32xf32>
    %11 = arith.addf %7, %10 : vector<1x32xf32>
    %c0_7 = arith.constant 0 : index
    %c0_8 = arith.constant 0 : index
    %c0_9 = arith.constant 0 : index
    %12 = vector.load %arg4[%c0_7, %c0_8, %c0_9] : memref<1x1x32xf32, #tpu.memory_space<vmem>>, vector<1x1x32xf32>
    %13 = vector.shape_cast %12 : vector<1x1x32xf32> to vector<1x32xf32>
    %14 = vector.shape_cast %11 : vector<1x32xf32> to vector<1x1x32xf32>
    tpu.vector_store %arg4[%c0_7, %c0_8, %c0_9], %14 {strides = array<i32>} : memref<1x1x32xf32, #tpu.memory_space<vmem>>, vector<1x1x32xf32>,
    return
  }
  func.func @transform_0(%arg0: i32, %arg1: i32) -> (i32, i32) {
    %c1_i32 = arith.constant 1 : i32
    %0 = arith.muli %arg0, %c1_i32 : i32
    %1 = arith.addi %0, %arg1 : i32
    %c0_i32 = arith.constant 0 : i32
    %2 = arith.minsi %1, %c0_i32 : i32
    %c0_i32_0 = arith.constant 0 : i32
    %c0_i32_1 = arith.constant 0 : i32
    return %2, %c0_i32_0 : i32, i32
  }
  func.func @transform_1(%arg0: i32, %arg1: i32) -> (i32, i32) {
    %c1_i32 = arith.constant 1 : i32
    %0 = arith.muli %arg0, %c1_i32 : i32
    %1 = arith.addi %0, %arg1 : i32
    %c0_i32 = arith.constant 0 : i32
    %2 = arith.minsi %1, %c0_i32 : i32
    %c0_i32_0 = arith.constant 0 : i32
    %c0_i32_1 = arith.constant 0 : i32
    return %2, %c0_i32_0 : i32, i32
  }
  func.func @transform_2(%arg0: i32, %arg1: i32) -> (i32, i32, i32) {
    %c0_i32 = arith.constant 0 : i32
    %c0_i32_0 = arith.constant 0 : i32
    %c0_i32_1 = arith.constant 0 : i32
    return %arg0, %c0_i32, %c0_i32_0 : i32, i32, i32
  }
}

</mosaic_0001>

<bundles_post_ra>
// kernel: tpu_custom_call.1
= control target key start
LH: loop header
LB: loop body
LE: loop exit
PB: predicated region body
PF: predicated region fallthrough
CT: control target
= control target key end

     0   :  { %7 = vsyncpa [#allocation3], 0  ;;  %s212_s0 = inlined_call_operand.hbm [shape: f32[2,32], index: 0, kind: input, shape index: {}]   ;;  %s213_s1 = inlined_call_operand.hbm [shape: f32[2,32], index: 1, kind: input, shape index: {}]   ;;  %s214_s2 = inlined_call_operand.hbm [shape: f32[1,1,32], index: 2, kind: output, shape index: {}]  }
   0x1   :  { %8 = vsyncpa [#allocation6], 0 }
   0x2   :  { %9 = vsyncpa [#allocation4], 0  ;;  %s20_s11 = sshll.u32 %s212_s0, 4  ;;  %s182_s12 = smov [#allocation2]   ;;  %s21_s11 = int_to_ptr.hbm [resolvable:$true] %s20_s11 }
   0x3   :  { %s22_s13 = sshll.u32 %s182_s12, 4  ;;  %s36_s16 = sshll.u32 %s213_s1, 4  ;;  %s23_s13 = int_to_ptr.vmem [resolvable:$true] %s22_s13  ;;  %s37_s16 = int_to_ptr.hbm [resolvable:$true] %s36_s16 }
   0x4   :  { %25 = dma.hbm_to_vmem [thread:$0]  %s21_s11, 32, %s23_s13, [#allocation3]  }
   0x5   :  { %s183_s17 = smov [#allocation5]  }
   0x6   :  { %s38_s18 = sshll.u32 %s183_s17, 4  ;;  %s39_s18 = int_to_ptr.vmem [resolvable:$true] %s38_s18 }
   0x7   :  { %41 = dma.hbm_to_vmem [thread:$0]  %s37_s16, 32, %s39_s18, [#allocation6]  }
   0x8   :  { %176 = dma.done.wait [#allocation3], 32  }
   0x9   :  { %177 = vsyncadd [#allocation3], 4294967264 }
   0xa   :  { %178 = dma.done.wait [#allocation6], 32  }
   0xb   :  { %179 = vsyncadd [#allocation6], 4294967264  ;;  %vm60_vm0 = vcmask 253952   ;;  %v184_v0 = vmov 0.0   ;;  %v62_v1 = vld [vmem:[#allocation2] sm:$0x3] }
   0xc   :  { %61 = vst.msk [vmem:[#allocation7] sm:$0x1] %vm60_vm0, %v184_v0  ;;  %v63_v2 = vld [vmem:[#allocation5] sm:$0x3]  ;;  %vm67_vm1 = vcmask 254976   ;;  %s185_s0 = smov [#allocation7]  }
   0xd   :  { %v64_v3 = vsub.f32 %v62_v1, %v63_v2  ;;  %s83_s1 = sshll.u32 %s185_s0, 4  ;;  %s85_s21 = sshll.u32 %s214_s2, 4  ;;  %s84_s1 = int_to_ptr.vmem [resolvable:$true] %s83_s1  ;;  %s86_s21 = int_to_ptr.hbm [resolvable:$true] %s85_s21 }
   0xf   :  { %v66_v4 = vmul.f32 %v64_v3, %v64_v3 }
  0x11   :  { %v68_v5 = vsel %vm67_vm1, %v66_v4, 0.0 }
  0x12   :  { %v69_v6 = vrot.slane %v68_v5, 4 }
  0x13   :  { %v65_v11 = vld [vmem:[#allocation7] sm:$0x1] }
  0x14   :  { %v70_v7 = vadd.f32 %v69_v6, %v68_v5 }
  0x16   :  { %v71_v8 = vrot.slane %v70_v7, 2 }
  0x18   :  { %v72_v9 = vadd.f32 %v71_v8, %v70_v7 }
  0x1a   :  { %v73_v10 = vrot.slane %v72_v9, 1 }
  0x1c   :  { %v74_v12 = vadd.f32 %v73_v10, %v72_v9 }
  0x1e   :  { %v75_v13 = vadd.f32 %v74_v12, %v65_v11 }
  0x20   :  { %77 = vst.msk [vmem:[#allocation7] sm:$0x1] %vm60_vm0, %v75_v13 }
  0x21   :  { %88 = dma.vmem_to_hbm [thread:$0]  %s84_s1, 16, %s86_s21, [#allocation4]  }
  0x22   :  { %180 = dma.done.wait [#allocation4], 16  }
  0x23   :  { %181 = vsyncadd [#allocation4], 4294967280 }
  0x24   :  { %93 = vsyncpa [#allocation3], 1 }
  0x25   :  { %94 = vsyncpa [#allocation6], 1 }
  0x26   :  { %95 = vsyncpa [#allocation4], 1 }

</bundles_post_ra>
